<compile_context>
chip_gen: v6e
topology: v6e:2x2x1
jax: 0.10.0
libtpu: 0.0.40
codegen_flags: <defaults>
</compile_context>

<pallas_src>
import jax
import jax.numpy as jnp
import numpy as np
from jax.experimental import pallas as pl
from jax.experimental.pallas import tpu as pltpu

_LANE = 128  # TPU lane width; lane-axis block sizes must be multiples of this.


def _cdiv(a, b):
    return -(-a // b)


def _round_up(x, m):
    return _cdiv(x, m) * m


def _policy_kernel(obs_ref, w1_ref, b1_ref, w2_ref, b2_ref, w3_ref, b3_ref,
                   mean_ref):
    """One batch tile in transposed layout: columns = batch rows (lane axis)."""
    x = obs_ref[...]                                            # [obs_dim, tb]
    # Layer 1: [h1, obs_dim] @ [obs_dim, tb] -> [h1, tb], f32 accumulate.
    h = jnp.dot(w1_ref[...], x, preferred_element_type=jnp.float32) + b1_ref[...]
    h = jnp.maximum(h, 0.0)
    # Layer 2: [h2, h1] @ [h1, tb] -> [h2, tb]
    h = jnp.dot(w2_ref[...], h.astype(w2_ref.dtype),
                preferred_element_type=jnp.float32) + b2_ref[...]
    h = jnp.maximum(h, 0.0)
    # Output layer: [act_dim, h2] @ [h2, tb] -> mean^T tile (lane-dense store).
    mean_ref[...] = (jnp.dot(w3_ref[...], h.astype(w3_ref.dtype),
                             preferred_element_type=jnp.float32)
                     + b3_ref[...]).astype(mean_ref.dtype)


def _mlp_reference(obs, params):
    h = jnp.maximum(obs @ params["w1"] + params["b1"], 0.0)
    h = jnp.maximum(h @ params["w2"] + params["b2"], 0.0)
    return h @ params["w3"] + params["b3"]


def _choose_tiling(B, tile_b):
    """Near-even batch tiling; >=2 (even) grid steps when B is large enough."""
    steps = max(1, _cdiv(B, tile_b))
    if B >= 2 * _LANE:
        # At least two (even count of) tiles so v7x megacore splits the grid.
        steps = max(2, steps + (steps % 2))
    tb = _round_up(_cdiv(B, steps), _LANE)   # batch sits on the lane axis
    return tb, steps


def policy_network_forward(obs, params, *, tile_b=4096,
                           stream_dtype=jnp.bfloat16, min_pallas_batch=256):
    """PolicyNetwork forward pass.

    obs: [B, obs_dim] float32
    params: dict with w1 [obs_dim,h1], b1 [h1], w2 [h1,h2], b2 [h2],
            w3 [h2,act_dim], b3 [act_dim], log_std [act_dim]
    returns: (mean [B, act_dim], std [act_dim])
    """
    B, obs_dim = obs.shape
    h1 = params["w1"].shape[1]
    h2 = params["w2"].shape[1]
    act_dim = params["w3"].shape[1]

    std = jnp.exp(params["log_std"])   # batch-independent -> stays in wrapper

    if B < min_pallas_batch:
        # Tiny rollout batches: plain XLA fusion beats custom-call overhead.
        return _mlp_reference(obs, params), std

    tb, steps = _choose_tiling(B, tile_b)
    B_pad = tb * steps

    # Lane-dense transposed activations: batch on the 128-lane axis.
    obs_t = obs.T.astype(stream_dtype)                     # [obs_dim, B]
    if B_pad != B:
        obs_t = jnp.pad(obs_t, ((0, 0), (0, B_pad - B)))

    w1_t = params["w1"].T.astype(stream_dtype)             # [h1, obs_dim]
    w2_t = params["w2"].T.astype(stream_dtype)             # [h2, h1]
    w3_t = params["w3"].T.astype(stream_dtype)             # [act_dim, h2]
    b1 = params["b1"].reshape(h1, 1).astype(jnp.float32)
    b2 = params["b2"].reshape(h2, 1).astype(jnp.float32)
    b3 = params["b3"].reshape(act_dim, 1).astype(jnp.float32)

    # Streamed batch tiles (auto double-buffered by the BlockSpec pipeline).
    obs_spec = pl.BlockSpec((obs_dim, tb), lambda i: (0, i))
    mean_spec = pl.BlockSpec((act_dim, tb), lambda i: (0, i))

    # VMEM-resident parameters: constant block index across the batch grid.
    def pinned(shape):
        return pl.BlockSpec(shape, lambda i: (0, 0))

    stream_bytes = np.dtype(stream_dtype).itemsize
    flops = 2 * B_pad * (obs_dim * h1 + h1 * h2 + h2 * act_dim)
    param_bytes = (stream_bytes * (obs_dim * h1 + h1 * h2 + h2 * act_dim)
                   + 4 * (h1 + h2 + act_dim))
    bytes_accessed = (stream_bytes * B_pad * obs_dim
                      + 4 * B_pad * act_dim + param_bytes)
    cost = pl.CostEstimate(flops=flops, transcendentals=0,
                           bytes_accessed=bytes_accessed)

    mean_t = pl.pallas_call(
        _policy_kernel,
        out_shape=jax.ShapeDtypeStruct((act_dim, B_pad), jnp.float32),
        grid=(steps,),
        in_specs=[
            obs_spec,
            pinned((h1, obs_dim)), pinned((h1, 1)),
            pinned((h2, h1)), pinned((h2, 1)),
            pinned((act_dim, h2)), pinned((act_dim, 1)),
        ],
        out_specs=mean_spec,
        compiler_params=pltpu.CompilerParams(
            dimension_semantics=("parallel",)),
        cost_estimate=cost,
    )(obs_t, w1_t, b1, w2_t, b2, w3_t, b3)

    mean = mean_t[:, :B].T   # back to the external [B, act_dim] contract
    return mean, std


def init_params(key, obs_dim, hidden_sizes, act_dim):
    """PyTorch nn.Linear-style init (U[-1/sqrt(fan_in), 1/sqrt(fan_in)])."""
    sizes = [obs_dim] + list(hidden_sizes) + [act_dim]
    params = {}
    names = ["1", "2", "3"]
    for i, (fan_in, fan_out) in enumerate(zip(sizes[:-1], sizes[1:])):
        key, kw, kb = jax.random.split(key, 3)
        bound = 1.0 / jnp.sqrt(jnp.float32(fan_in))
        params["w" + names[i]] = jax.random.uniform(
            kw, (fan_in, fan_out), jnp.float32, -bound, bound)
        params["b" + names[i]] = jax.random.uniform(
            kb, (fan_out,), jnp.float32, -bound, bound)
    params["log_std"] = -0.5 * jnp.ones((act_dim,), jnp.float32)
    return params


def _reference(obs, params):
    return _mlp_reference(obs, params), jnp.exp(params["log_std"])


if __name__ == "__main__":
    # Small shapes consistent with the module: obs_dim=16, hidden=[32, 32], act_dim=8.
    B, OBS_DIM, ACT_DIM = 2, 16, 8
    HIDDEN = [32, 32]

    key = jax.random.PRNGKey(0)
    key, k_obs = jax.random.split(key)
    obs = jax.random.normal(k_obs, (B, OBS_DIM), jnp.float32)
    params = init_params(key, OBS_DIM, HIDDEN, ACT_DIM)

    # 1) Small batch, forced through the Pallas kernel with f32 streaming.
    mean, std = policy_network_forward(obs, params,
                                       stream_dtype=jnp.float32,
                                       min_pallas_batch=1)
    jax.block_until_ready((mean, std))
    mean_ref, std_ref = _reference(obs, params)
    assert mean.shape == (B, ACT_DIM) and std.shape == (ACT_DIM,)
    # Loose enough to tolerate MXU f32-pass differences vs XLA's dot.
    assert jnp.allclose(mean, mean_ref, atol=1e-2, rtol=1e-2)
    assert jnp.allclose(std, std_ref, atol=1e-6, rtol=1e-6)

    # 2) Larger batch through the default path (bf16 streaming, multi-tile grid,
    #    lane-dense transposed layout, padding path B=600 -> 2 x 384).
    B2 = 600
    key, k_obs2 = jax.random.split(key)
    obs2 = jax.random.normal(k_obs2, (B2, OBS_DIM), jnp.float32)
    mean2, std2 = policy_network_forward(obs2, params)
    jax.block_until_ready((mean2, std2))
    mean2_ref, _ = _reference(obs2, params)
    assert mean2.shape == (B2, ACT_DIM)
    # bf16-quantized inputs -> looser tolerance (per perf-review guidance).
    assert jnp.allclose(mean2, mean2_ref, atol=5e-2, rtol=5e-2)
    assert jnp.allclose(std2, std_ref, atol=1e-6, rtol=1e-6)

    # 3) Tiny-batch auto path falls back to plain XLA (exact).
    mean3, _ = policy_network_forward(obs, params)
    jax.block_until_ready(mean3)
    assert jnp.allclose(mean3, mean_ref, atol=1e-5, rtol=1e-5)

    print("KERNEL_OK")
</pallas_src>

<mosaic_0001>
module attributes {stable_mosaic.version = 11 : i64} {
  func.func @_policy_kernel(%arg0: i32, %arg1: memref<16x128xf32, #tpu.memory_space<vmem>>, %arg2: memref<32x16xf32, #tpu.memory_space<vmem>>, %arg3: memref<32x1xf32, #tpu.memory_space<vmem>>, %arg4: memref<32x32xf32, #tpu.memory_space<vmem>>, %arg5: memref<32x1xf32, #tpu.memory_space<vmem>>, %arg6: memref<8x32xf32, #tpu.memory_space<vmem>>, %arg7: memref<8x1xf32, #tpu.memory_space<vmem>>, %arg8: memref<8x128xf32, #tpu.memory_space<vmem>>) attributes {dimension_semantics = [#tpu.dimension_semantics<parallel>], iteration_bounds = array<i64: 1>, scalar_prefetch = 0 : i64, scratch_operands = 0 : i64, tpu.core_type = #tpu.core_type<tc>, window_params = [{transform_indices = @transform_0, window_bounds = array<i64: 16, 128>}, {pipeline_mode = #tpu.pipeline_mode<synchronous>, transform_indices = @transform_1, window_bounds = array<i64: 32, 16>}, {pipeline_mode = #tpu.pipeline_mode<synchronous>, transform_indices = @transform_2, window_bounds = array<i64: 32, 1>}, {pipeline_mode = #tpu.pipeline_mode<synchronous>, transform_indices = @transform_3, window_bounds = array<i64: 32, 32>}, {pipeline_mode = #tpu.pipeline_mode<synchronous>, transform_indices = @transform_4, window_bounds = array<i64: 32, 1>}, {pipeline_mode = #tpu.pipeline_mode<synchronous>, transform_indices = @transform_5, window_bounds = array<i64: 8, 32>}, {pipeline_mode = #tpu.pipeline_mode<synchronous>, transform_indices = @transform_6, window_bounds = array<i64: 8, 1>}, {transform_indices = @transform_7, window_bounds = array<i64: 8, 128>}]} {
    %c0 = arith.constant 0 : index
    %c0_0 = arith.constant 0 : index
    %0 = vector.load %arg1[%c0, %c0_0] : memref<16x128xf32, #tpu.memory_space<vmem>>, vector<16x128xf32>
    %c0_1 = arith.constant 0 : index
    %c0_2 = arith.constant 0 : index
    %1 = vector.load %arg2[%c0_1, %c0_2] : memref<32x16xf32, #tpu.memory_space<vmem>>, vector<32x16xf32>
    %cst = arith.constant dense<0.000000e+00> : vector<32x128xf32>
    %2 = tpu.matmul %1, %0, %cst {dimension_numbers = #tpu.dot_dimension_numbers<[1], [0], [0], [1], [0, 0, 1, 1], [], []>} : vector<32x16xf32>, vector<16x128xf32>, vector<32x128xf32> -> vector<32x128xf32>
    %c0_3 = arith.constant 0 : index
    %c0_4 = arith.constant 0 : index
    %3 = vector.load %arg3[%c0_3, %c0_4] : memref<32x1xf32, #tpu.memory_space<vmem>>, vector<32x1xf32>
    %4 = vector.broadcast %3 : vector<32x1xf32> to vector<32x128xf32>
    %5 = arith.addf %2, %4 : vector<32x128xf32>
    %cst_5 = arith.constant 0.000000e+00 : f32
    %6 = vector.broadcast %cst_5 : f32 to vector<32x128xf32>
    %7 = arith.maximumf %5, %6 : vector<32x128xf32>
    %c0_6 = arith.constant 0 : index
    %c0_7 = arith.constant 0 : index
    %8 = vector.load %arg4[%c0_6, %c0_7] : memref<32x32xf32, #tpu.memory_space<vmem>>, vector<32x32xf32>
    %cst_8 = arith.constant dense<0.000000e+00> : vector<32x128xf32>
    %9 = tpu.matmul %8, %7, %cst_8 {dimension_numbers = #tpu.dot_dimension_numbers<[1], [0], [0], [1], [0, 0, 1, 1], [], []>} : vector<32x32xf32>, vector<32x128xf32>, vector<32x128xf32> -> vector<32x128xf32>
    %c0_9 = arith.constant 0 : index
    %c0_10 = arith.constant 0 : index
    %10 = vector.load %arg5[%c0_9, %c0_10] : memref<32x1xf32, #tpu.memory_space<vmem>>, vector<32x1xf32>
    %11 = vector.broadcast %10 : vector<32x1xf32> to vector<32x128xf32>
    %12 = arith.addf %9, %11 : vector<32x128xf32>
    %cst_11 = arith.constant 0.000000e+00 : f32
    %13 = vector.broadcast %cst_11 : f32 to vector<32x128xf32>
    %14 = arith.maximumf %12, %13 : vector<32x128xf32>
    %c0_12 = arith.constant 0 : index
    %c0_13 = arith.constant 0 : index
    %15 = vector.load %arg6[%c0_12, %c0_13] : memref<8x32xf32, #tpu.memory_space<vmem>>, vector<8x32xf32>
    %cst_14 = arith.constant dense<0.000000e+00> : vector<8x128xf32>
    %16 = tpu.matmul %15, %14, %cst_14 {dimension_numbers = #tpu.dot_dimension_numbers<[1], [0], [0], [1], [0, 0, 1, 1], [], []>} : vector<8x32xf32>, vector<32x128xf32>, vector<8x128xf32> -> vector<8x128xf32>
    %c0_15 = arith.constant 0 : index
    %c0_16 = arith.constant 0 : index
    %17 = vector.load %arg7[%c0_15, %c0_16] : memref<8x1xf32, #tpu.memory_space<vmem>>, vector<8x1xf32>
    %18 = vector.broadcast %17 : vector<8x1xf32> to vector<8x128xf32>
    %19 = arith.addf %16, %18 : vector<8x128xf32>
    %c0_17 = arith.constant 0 : index
    %c0_18 = arith.constant 0 : index
    %20 = vector.load %arg8[%c0_17, %c0_18] : memref<8x128xf32, #tpu.memory_space<vmem>>, vector<8x128xf32>
    tpu.vector_store %arg8[%c0_17, %c0_18], %19 {strides = array<i32>} : memref<8x128xf32, #tpu.memory_space<vmem>>, vector<8x128xf32>,
    return
  }
  func.func @transform_0(%arg0: i32) -> (i32, i32) {
    %c0_i32 = arith.constant 0 : i32
    %c0_i32_0 = arith.constant 0 : i32
    return %c0_i32, %arg0 : i32, i32
  }
  func.func @transform_1(%arg0: i32) -> (i32, i32) {
    %c0_i32 = arith.constant 0 : i32
    %c0_i32_0 = arith.constant 0 : i32
    %c0_i32_1 = arith.constant 0 : i32
    return %c0_i32, %c0_i32_0 : i32, i32
  }
  func.func @transform_2(%arg0: i32) -> (i32, i32) {
    %c0_i32 = arith.constant 0 : i32
    %c0_i32_0 = arith.constant 0 : i32
    %c0_i32_1 = arith.constant 0 : i32
    return %c0_i32, %c0_i32_0 : i32, i32
  }
  func.func @transform_3(%arg0: i32) -> (i32, i32) {
    %c0_i32 = arith.constant 0 : i32
    %c0_i32_0 = arith.constant 0 : i32
    %c0_i32_1 = arith.constant 0 : i32
    return %c0_i32, %c0_i32_0 : i32, i32
  }
  func.func @transform_4(%arg0: i32) -> (i32, i32) {
    %c0_i32 = arith.constant 0 : i32
    %c0_i32_0 = arith.constant 0 : i32
    %c0_i32_1 = arith.constant 0 : i32
    return %c0_i32, %c0_i32_0 : i32, i32
  }
  func.func @transform_5(%arg0: i32) -> (i32, i32) {
    %c0_i32 = arith.constant 0 : i32
    %c0_i32_0 = arith.constant 0 : i32
    %c0_i32_1 = arith.constant 0 : i32
    return %c0_i32, %c0_i32_0 : i32, i32
  }
  func.func @transform_6(%arg0: i32) -> (i32, i32) {
    %c0_i32 = arith.constant 0 : i32
    %c0_i32_0 = arith.constant 0 : i32
    %c0_i32_1 = arith.constant 0 : i32
    return %c0_i32, %c0_i32_0 : i32, i32
  }
  func.func @transform_7(%arg0: i32) -> (i32, i32) {
    %c0_i32 = arith.constant 0 : i32
    %c0_i32_0 = arith.constant 0 : i32
    return %c0_i32, %arg0 : i32, i32
  }
}

</mosaic_0001>

<bundles_post_ra>
// kernel: tpu_custom_call.1
= control target key start
LH: loop header
LB: loop body
LE: loop exit
PB: predicated region body
PF: predicated region fallthrough
CT: control target
= control target key end

     0   :  { %vm57_vm0 = vcmask 130048   ;;  %v475_v4 = vmov 0   ;;  %s591_s0 = inlined_call_operand.vmem [shape: f32[16,128], index: 0, kind: input, shape index: {}]   ;;  %s592_s1 = inlined_call_operand.vmem [shape: f32[32,16], index: 1, kind: input, shape index: {}]   ;;  %s593_s2 = inlined_call_operand.vmem [shape: f32[32,1], index: 2, kind: input, shape index: {}]   ;;  %s594_s3 = inlined_call_operand.vmem [shape: f32[32,32], index: 3, kind: input, shape index: {}]   ;;  %s595_s4 = inlined_call_operand.vmem [shape: f32[32,1], index: 4, kind: input, shape index: {}]   ;;  %s596_s5 = inlined_call_operand.vmem [shape: f32[8,32], index: 5, kind: input, shape index: {}]   ;;  %s597_s6 = inlined_call_operand.vmem [shape: f32[8,1], index: 6, kind: input, shape index: {}]   ;;  %s598_s7 = inlined_call_operand.hbm [shape: f32[8,128], index: 7, kind: output, shape index: {}]  }
   0x1   :  { %v28_v0 = vld [vmem:[%s591_s0 + $0x8] sm:$0xff]  ;;  %v27_v1 = vld [vmem:[%s591_s0] sm:$0xff]  ;;  %451 = vset.pattern.permute.xlu0 %v475_v4  ;;  %v36_v5 = vld [vmem:[%s593_s2 + $0x18] sm:$0xff]  ;;  %452 = vset.pattern.permute.xlu1 %v475_v4 }
   0x2   :  { %v29_v2 = vld [vmem:[%s592_s1] sm:$0xff]  ;;  %412 = vmatprep.subr.mxu0 %v28_v0  ;;  %v30_v3 = vld [vmem:[%s592_s1 + $0x8] sm:$0xff]  ;;  %v31_v6 = vld [vmem:[%s592_s1 + $0x10] sm:$0xff]  ;;  %54 = vperm.xlu0 %451, %v36_v5  }
   0x3   :  { %416 = vmatprep.mubr.msk.f32.mxu0 %vm57_vm0, %v29_v2  ;;  %413 = vmatpush3.msra.mxu0 %v28_v0  ;;  %v34_v7 = vld [vmem:[%s593_s2 + $0x8] sm:$0xff]  ;;  %v35_v8 = vld [vmem:[%s593_s2 + $0x10] sm:$0xff] }
   0x4   :  { %414 = vmatprep.subr.mxu0 %v27_v1  ;;  %44 = vperm.xlu1 %452, %v34_v7  }
   0x5   :  { %415 = vmatpush3.msra.mxu0 %v27_v1 }
   0x6   :  { %417 = vmatmul.mubr.msk.f32.vlgmr.msra.gmra.mxu0 %vm57_vm0, %v30_v3 }
   0x7   :  { %12 = vsyncpa [#allocation3], 0  ;;  %419 = vmatprep.mubr.msk.f32.mxu0 %vm57_vm0, %v31_v6  ;;  %v32_v9 = vld [vmem:[%s592_s1 + $0x18] sm:$0xff]  ;;  %v33_v10 = vld [vmem:[%s593_s2] sm:$0xff]  ;;  %49 = vperm.xlu0 %451, %v35_v8   ;;  %vm187_vm1 = vcmask 261120   ;;  %v476_v36 = vmov 0.0  }
   0x8   :  { %v166_v11 = vld [vmem:[%s595_s4 + $0x18] sm:$0xff]  ;;  %39 = vperm.xlu1 %452, %v33_v10   ;;  %v165_v12 = vld [vmem:[%s595_s4 + $0x10] sm:$0xff]  ;;  %v164_v13 = vld [vmem:[%s595_s4 + $0x8] sm:$0xff]  ;;  %436 = vmatprep.subr.mxu0 %v476_v36  ;;  %vm477_vm2 = vmmov 0   ;;  %s478_s11 = smov [#allocation2]  }
   0x9   :  { %v163_v14 = vld [vmem:[%s595_s4] sm:$0xff]  ;;  %v160_v33 = vld [vmem:[%s594_s3 + $0x8] sm:$0xff]  ;;  %v161_v34 = vld [vmem:[%s594_s3 + $0x10] sm:$0xff]  ;;  %s376_s12 = sshll.u32 %s478_s11, 4  ;;  %s377_s12 = int_to_ptr.vmem [resolvable:$true] %s376_s12 }
   0xa   :  { %420 = vmatmul.mubr.msk.f32.gmra.mxu0 %vm57_vm0, %v32_v9  ;;  %v290_v15 = vld [vmem:[%s597_s6] sm:$0xff]  ;;  %v162_v35 = vld [vmem:[%s594_s3 + $0x18] sm:$0xff]  ;;  %s453_s13 = scalar_lea.vmem %s377_s12, 128  ;;  %p458_p1 = scmp.lt.s32.totalorder %s377_s12, %s377_s12 }
   0xb   :  { %184 = vperm.xlu0 %451, %v166_v11   ;;  %v159_v16 = vld [vmem:[%s594_s3] sm:$0xff]  ;;  %444 = vmatprep.mubr.msk.f32.mxu0 %vm477_vm2, %v476_v36  ;;  %p454_p0 = scmp.ne.s32.totalorder %s377_s12, %s453_s13  ;;  %p459_p2 = scmp.lt.s32.totalorder %s453_s13, %s453_s13 }
   0xc   :  { %179 = vperm.xlu1 %452, %v165_v12   ;;  %430 = vmatprep.mubr.msk.f32.mxu1 %vm187_vm1, %v159_v16  ;;  %v289_v53 = vld [vmem:[%s596_s5] sm:$0xff] }
   0xd   :  { %p460_p3 = por %p459_p2, %p458_p1 }
   0xf   :  { %174 = vperm.xlu0 %451, %v164_v13   ;;  %p461_p4 = pnand %p460_p3, %p454_p0 }
  0x10   :  { %169 = vperm.xlu1 %452, %v163_v14  }
  0x13   :  { %293 = vperm.xlu0 %451, %v290_v15  }
  0x7d   :  { %v55_v17 = vpop.permute.xlu0 %54 }
  0x7f   :  { %v45_v19 = vpop.permute.xlu1 %44 }
  0x82   :  { %v50_v23 = vpop.permute.xlu0 %49 }
  0x83   :  { %v40_v28 = vpop.permute.xlu1 %39 }
  0x86   :  { %v185_v37 = vpop.permute.xlu0 %184 }
  0x87   :  { %v180_v39 = vpop.permute.xlu1 %179 }
  0x8a   :  { %v175_v43 = vpop.permute.xlu0 %174 }
  0x8b   :  { %v170_v48 = vpop.permute.xlu1 %169 }
  0x8e   :  { %v294_v54 = vpop.permute.xlu0 %293 }
  0xc6   :  { %v418_v18 = vpop.f32.mrf.mxu0 }
  0xc7   :  { %v142_v25 = vadd.f32 %v418_v18, %v45_v19 }
  0xc8   :  { %v136_v20 = vpop.f32.mrf.mxu0 }
  0xc9   :  { %v137_v29 = vadd.f32 %v136_v20, %v40_v28  ;;  %v156_v31 = vmax.f32 %v142_v25, 0.0 }
  0xca   :  { %v421_v21 = vpop.f32.mrf.mxu0 }
  0xcb   :  { %v152_v22 = vadd.f32 %v421_v21, %v55_v17  ;;  %v155_v32 = vmax.f32 %v137_v29, 0.0 }
  0xcc   :  { %v146_v24 = vpop.f32.mrf.mxu0 }
  0xcd   :  { %v158_v26 = vmax.f32 %v152_v22, 0.0  ;;  %v147_v27 = vadd.f32 %v146_v24, %v50_v23 }
  0xcf   :  { %v157_v30 = vmax.f32 %v147_v27, 0.0  ;;  %422 = vmatprep.subr.mxu1 %v158_v26 }
  0xd0   :  { %423 = vmatpush3.msra.mxu1 %v158_v26 }
  0xd1   :  { %424 = vmatprep.subr.mxu1 %v157_v30 }
  0xd2   :  { %425 = vmatpush3.msra.mxu1 %v157_v30 }
  0xd3   :  { %426 = vmatprep.subr.mxu1 %v156_v31 }
  0xd4   :  { %427 = vmatpush3.msra.mxu1 %v156_v31 }
  0xd5   :  { %428 = vmatprep.subr.mxu1 %v155_v32 }
  0xd6   :  { %429 = vmatpush3.msra.mxu1 %v155_v32 }
  0xd7   :  { %431 = vmatmul.mubr.msk.f32.vlgmr.msra.gmra.mxu1 %vm187_vm1, %v160_v33 }
  0xd8   :  { %433 = vmatprep.mubr.msk.f32.mxu1 %vm187_vm1, %v161_v34 }
  0xdb   :  { %434 = vmatmul.mubr.msk.f32.gmra.mxu1 %vm187_vm1, %v162_v35 }
 0x197   :  { %v432_v38 = vpop.f32.mrf.mxu1 }
 0x198   :  { %v272_v45 = vadd.f32 %v432_v38, %v175_v43 }
 0x199   :  { %v266_v40 = vpop.f32.mrf.mxu1 }
 0x19a   :  { %v267_v49 = vadd.f32 %v266_v40, %v170_v48  ;;  %v286_v51 = vmax.f32 %v272_v45, 0.0 }
 0x19b   :  { %v435_v41 = vpop.f32.mrf.mxu1 }
 0x19c   :  { %v282_v42 = vadd.f32 %v435_v41, %v185_v37  ;;  %v285_v52 = vmax.f32 %v267_v49, 0.0 }
 0x19d   :  { %v276_v44 = vpop.f32.mrf.mxu1 }
 0x19e   :  { %v288_v46 = vmax.f32 %v282_v42, 0.0  ;;  %v277_v47 = vadd.f32 %v276_v44, %v180_v39 }
 0x1a0   :  { %v287_v50 = vmax.f32 %v277_v47, 0.0  ;;  %437 = vmatpush3.msra.mxu0 %v288_v46 }
 0x1a1   :  { %438 = vmatprep.subr.mxu0 %v476_v36 }
 0x1a2   :  { %439 = vmatpush3.msra.mxu0 %v287_v50 }
 0x1a3   :  { %440 = vmatprep.subr.mxu0 %v476_v36 }
 0x1a4   :  { %441 = vmatpush3.msra.mxu0 %v286_v51 }
 0x1a5   :  { %442 = vmatprep.subr.mxu0 %v476_v36 }
 0x1a6   :  { %443 = vmatpush3.msra.mxu0 %v285_v52 }
 0x1a7   :  { %445 = vmatmul.mubr.msk.f32.vlgmr.msra.gmra.mxu0 %vm187_vm1, %v289_v53 }
 0x267   :  { %v365_v55 = vpop.f32.mrf.mxu0 }
 0x268   :  { %v366_v56 = vadd.f32 %v365_v55, %v294_v54 }
 0x269   :  { %v446_v57 = vpop.f32.mrf.mxu0 }
 0x26a   :  { %369 = vst [vmem:[#allocation2] sm:$0xff] %v366_v56 }
 0x26b   :  { %464 = shalt.err (!%p461_p4)
}
 0x26c   :  { %379 = dma.vmem_to_hbm [thread:$0]  %s377_s12, 128, %s598_s7, [#allocation3]  }
 0x26d   :  { %473 = dma.done.wait [#allocation3], 128  }
 0x26e   :  { %474 = vsyncadd [#allocation3], 4294967168 }
 0x26f   :  { %383 = vsyncpa [#allocation3], 1 }

</bundles_post_ra>
